<compile_context>
chip_gen: v6e
topology: v6e:2x2x1
jax: 0.10.0
libtpu: 0.0.40
codegen_flags: <defaults>
</compile_context>

<pallas_src>
import functools
import numpy as np
import jax
import jax.numpy as jnp
from jax import lax
from jax.experimental import pallas as pl
from jax.experimental.pallas import tpu as pltpu


# ----------------------------------------------------------------------------
# Constant matrices reproducing AdaptiveAvgPool2d / bilinear interpolation.
# ----------------------------------------------------------------------------
def adaptive_pool_matrix(in_size: int, out_size: int) -> np.ndarray:
    """(out_size, in_size): row i averages input[start_i:end_i] (PyTorch bins)."""
    P = np.zeros((out_size, in_size), dtype=np.float32)
    for i in range(out_size):
        start = (i * in_size) // out_size
        end = -(-((i + 1) * in_size) // out_size)  # ceil
        P[i, start:end] = 1.0 / (end - start)
    return P


def bilinear_matrix(out_size: int, in_size: int) -> np.ndarray:
    """(out_size, in_size): bilinear upsample weights, align_corners=False
    (matches the module's F.interpolate(..., align_corners=False))."""
    U = np.zeros((out_size, in_size), dtype=np.float32)
    scale = in_size / out_size
    for y in range(out_size):
        src = (y + 0.5) * scale - 0.5
        src = max(src, 0.0)
        i0 = min(int(np.floor(src)), in_size - 1)
        i1 = min(i0 + 1, in_size - 1)
        lam = src - i0
        U[y, i0] += 1.0 - lam
        U[y, i1] += lam
    return U


# ----------------------------------------------------------------------------
# Kernel A: adaptive pooling (all stages in one matmul) + per-stage folded
#           1x1 conv, producing the tiny projected pyramid (OUT, S2) per image.
# ----------------------------------------------------------------------------
def pool_project_kernel(x2d_ref, pT_ref, wfs_ref, proj_ref, *, sizes):
    # x2d_ref : (Nb*C, HW)   bf16  -- Nb packed batches -> M = Nb*C MXU rows
    # pT_ref  : (HW, S2)     bf16  -- stacked pooling matrices, all stages
    # wfs_ref : (G, OUT, C)  f32   -- Wb_g @ Ws_g folded per stage
    # proj_ref: (Nb, OUT, S2) f32  -- per-stage projected pooled features
    G, OUT, C = wfs_ref.shape
    nb = proj_ref.shape[0]
    S2 = proj_ref.shape[2]

    # One pooling matmul for all stages and all packed batches.
    pooled = jnp.dot(x2d_ref[...], pT_ref[...],
                     preferred_element_type=jnp.float32)        # (Nb*C, S2) f32

    # Column masks selecting each stage's s*s pooled bins (hoisted once).
    col = lax.broadcasted_iota(jnp.int32, (OUT, S2), 1)
    masks, off = [], 0
    for s in sizes:
        masks.append((col >= off) & (col < off + s * s))
        off += s * s

    for b in range(nb):
        pb = pooled[b * C:(b + 1) * C, :]                       # (C, S2) f32
        acc = jnp.zeros((OUT, S2), jnp.float32)
        for g in range(G):
            fp = jnp.dot(wfs_ref[g], pb,
                         preferred_element_type=jnp.float32)    # (OUT, S2)
            acc = jnp.where(masks[g], fp, acc)
        proj_ref[b] = acc


# ----------------------------------------------------------------------------
# Kernel B: fused bilinear upsample of all stages + bottleneck identity branch
#           + bias + ReLU, tiled over HW (both grid axes parallel).
# ----------------------------------------------------------------------------
def upsample_bottleneck_kernel(proj_ref, x_ref, mT_ref, wid_ref, b_ref, o_ref):
    # proj_ref: (OUT, S2)  f32  (grid-invariant over the hw-tile axis)
    # x_ref   : (C, THW)   bf16
    # mT_ref  : (S2, THW)  f32  -- stacked bilinear-upsample matrices
    # wid_ref : (OUT, C)   bf16 -- bottleneck slice acting on the identity branch
    # b_ref   : (OUT, 1)   f32
    acc = jnp.dot(proj_ref[...], mT_ref[...],
                  preferred_element_type=jnp.float32)           # (OUT, THW)
    acc = acc + jnp.dot(wid_ref[...], x_ref[...],
                        preferred_element_type=jnp.float32)
    acc = acc + b_ref[...]
    o_ref[...] = jnp.maximum(acc, 0.0).astype(o_ref.dtype)


# ----------------------------------------------------------------------------
# Wrapper
# ----------------------------------------------------------------------------
def _pick_batch_block(n, c):
    # Pack as many batches per step as divide N while keeping the packed row
    # count sublane-aligned (multiple of 8) -- fills MXU rows when C is small.
    for cand in (8, 4, 2, 1):
        if n % cand == 0 and (cand * c) % 8 == 0:
            return cand
    return n  # fall back: one step over the whole batch (block == full array)


def _pick_hw_tile(hw, target):
    if hw % 128 != 0:
        return hw  # full extent (still a legal block: equals the array dim)
    t = min(max(target - target % 128, 128), hw)
    while hw % t != 0:
        t -= 128
    return t


def psp_module_forward(x_nchw, stage_w, bott_w, bias, sizes=(1, 2, 3, 6),
                       *, out_dtype=jnp.float32, hw_tile_target=512):
    """x_nchw: (N, C, H, W) f32 -> (N, OUT, H, W) out_dtype (ReLU'd).

    stage_w: list of (C, C) 1x1-conv weights (out_ch, in_ch), one per size.
    bott_w : (OUT, 5*C) bottleneck 1x1-conv weight, concat order [p*, x].
    bias   : (OUT,) bottleneck bias.
    """
    N, C, H, W = x_nchw.shape
    HW = H * W
    OUT = bias.shape[0]
    G = len(sizes)
    S2 = int(sum(s * s for s in sizes))

    nb = _pick_batch_block(N, C)
    thw = _pick_hw_tile(HW, hw_tile_target)

    # Channel-major, lane-dense layouts (free reshapes of NCHW).
    x_flat = x_nchw.reshape(N, C, HW).astype(jnp.bfloat16)
    x2d = x_flat.reshape(N * C, HW)

    # Stacked pooling matrix P_all (S2, HW); kernel A consumes P_all^T.
    P_all = np.concatenate(
        [np.kron(adaptive_pool_matrix(H, s), adaptive_pool_matrix(W, s))
         for s in sizes], axis=0)                               # (S2, HW)
    pT = jnp.asarray(P_all.T, dtype=jnp.bfloat16)               # (HW, S2)

    # Stacked bilinear upsample M^T (S2, HW); f32 (tiny) so the pooled path is
    # not re-quantized to bf16 before the upsample matmul.
    mT = jnp.asarray(
        np.concatenate(
            [np.kron(bilinear_matrix(H, s), bilinear_matrix(W, s)).T
             for s in sizes], axis=0),
        dtype=jnp.float32)                                      # (S2, HW)

    # Fold each stage 1x1 conv into its bottleneck slice: wfs[g] = Wb_g @ Ws_g.
    wfs = jnp.stack([bott_w[:, g * C:(g + 1) * C] @ stage_w[g]
                     for g in range(G)], axis=0).astype(jnp.float32)  # (G,OUT,C)
    wid = bott_w[:, G * C:(G + 1) * C].astype(jnp.bfloat16)     # identity branch
    b2 = bias.reshape(OUT, 1).astype(jnp.float32)

    # --- Kernel A: pooled-pyramid projection, grid over batch blocks. -------
    proj = pl.pallas_call(
        functools.partial(pool_project_kernel, sizes=tuple(sizes)),
        out_shape=jax.ShapeDtypeStruct((N, OUT, S2), jnp.float32),
        grid_spec=pltpu.PrefetchScalarGridSpec(
            num_scalar_prefetch=0,
            grid=(N // nb,),
            in_specs=[
                pl.BlockSpec((nb * C, HW), lambda i: (i, 0)),
                pl.BlockSpec((HW, S2), lambda i: (0, 0)),        # grid-invariant
                pl.BlockSpec((G, OUT, C), lambda i: (0, 0, 0)),  # grid-invariant
            ],
            out_specs=pl.BlockSpec((nb, OUT, S2), lambda i: (i, 0, 0)),
        ),
        compiler_params=pltpu.CompilerParams(
            dimension_semantics=("parallel",)),
        cost_estimate=pl.CostEstimate(
            flops=int(2 * N * C * HW * S2 + 2 * N * G * OUT * C * S2),
            transcendentals=0,
            bytes_accessed=int(x2d.size * 2 + pT.size * 2 + wfs.size * 4
                               + N * OUT * S2 * 4)),
    )(x2d, pT, wfs)

    # --- Kernel B: upsample + fused bottleneck + bias + ReLU, HW-tiled. -----
    out_flat = pl.pallas_call(
        upsample_bottleneck_kernel,
        out_shape=jax.ShapeDtypeStruct((N, OUT, HW), out_dtype),
        grid_spec=pltpu.PrefetchScalarGridSpec(
            num_scalar_prefetch=0,
            grid=(N, HW // thw),
            in_specs=[
                pl.BlockSpec((pl.Squeezed(), OUT, S2), lambda n, t: (n, 0, 0)),
                pl.BlockSpec((pl.Squeezed(), C, thw), lambda n, t: (n, 0, t)),
                pl.BlockSpec((S2, thw), lambda n, t: (0, t)),
                pl.BlockSpec((OUT, C), lambda n, t: (0, 0)),     # grid-invariant
                pl.BlockSpec((OUT, 1), lambda n, t: (0, 0)),     # grid-invariant
            ],
            out_specs=pl.BlockSpec((pl.Squeezed(), OUT, thw),
                                   lambda n, t: (n, 0, t)),
        ),
        compiler_params=pltpu.CompilerParams(
            dimension_semantics=("parallel", "parallel")),
        cost_estimate=pl.CostEstimate(
            flops=int(2 * N * OUT * HW * (S2 + C)),
            transcendentals=0,
            bytes_accessed=int(proj.size * 4 + x_flat.size * 2 + mT.size * 4
                               + wid.size * 2 + b2.size * 4
                               + N * OUT * HW * jnp.dtype(out_dtype).itemsize)),
    )(proj, x_flat, mT, wid, b2)

    # Free reshape back to NCHW.
    return out_flat.reshape(N, OUT, H, W)


# ----------------------------------------------------------------------------
# Pure-JAX reference mirroring the PyTorch module (no fusion, f32 math).
# ----------------------------------------------------------------------------
def psp_reference(x_nchw, stage_w, bott_w, bias, sizes=(1, 2, 3, 6)):
    N, C, H, W = x_nchw.shape
    HW = H * W
    xf = x_nchw.reshape(N, C, HW)
    parts = []
    for g, s in enumerate(sizes):
        P = jnp.asarray(np.kron(adaptive_pool_matrix(H, s),
                                adaptive_pool_matrix(W, s)))    # (s2, HW)
        M = jnp.asarray(np.kron(bilinear_matrix(H, s),
                                bilinear_matrix(W, s)))         # (HW, s2)
        pooled = jnp.einsum("ph,nch->ncp", P, xf)
        conv = jnp.einsum("dc,ncp->ndp", stage_w[g], pooled)
        up = jnp.einsum("hp,ndp->ndh", M, conv)
        parts.append(up)
    parts.append(xf)                                            # order [p*, x]
    cat = jnp.concatenate(parts, axis=1)                        # (N, 5C, HW)
    out = jnp.einsum("oc,nch->noh", bott_w, cat) + bias[None, :, None]
    out = jnp.maximum(out, 0.0)
    return out.reshape(N, bias.shape[0], H, W)


# ----------------------------------------------------------------------------
# Main
# ----------------------------------------------------------------------------
if __name__ == "__main__":
    # Small shapes consistent with the module (features=C, out_features=OUT).
    N, C, H, W = 2, 8, 16, 16
    OUT = 32
    SIZES = (1, 2, 3, 6)

    key = jax.random.PRNGKey(0)
    keys = jax.random.split(key, len(SIZES) + 3)

    x = jax.random.normal(keys[0], (N, C, H, W), dtype=jnp.float32)
    # PyTorch-shaped synthetic parameters:
    #   per-stage Conv2d(C, C, 1, bias=False)  -> (C, C)
    #   bottleneck Conv2d(5*C, OUT, 1)         -> (OUT, 5*C) + bias (OUT,)
    stage_w = [0.1 * jax.random.normal(keys[1 + g], (C, C), jnp.float32)
               for g in range(len(SIZES))]
    bott_w = 0.1 * jax.random.normal(keys[-2], (OUT, (len(SIZES) + 1) * C),
                                     jnp.float32)
    bias = 0.05 * jax.random.normal(keys[-1], (OUT,), jnp.float32)

    # hw_tile_target=128 so the HW-tile grid axis is exercised (2 tiles) even
    # at this toy spatial size; real sizes would use the 512-lane default.
    out = jax.block_until_ready(
        psp_module_forward(x, stage_w, bott_w, bias, SIZES, hw_tile_target=128))
    ref = jax.block_until_ready(psp_reference(x, stage_w, bott_w, bias, SIZES))

    assert out.shape == (N, OUT, H, W)
    # bf16 x / pooling / identity-branch operands with f32 accumulation vs a
    # pure-f32 reference.
    np.testing.assert_allclose(np.asarray(out), np.asarray(ref),
                               rtol=2e-2, atol=2e-2)

    print("KERNEL_OK")
</pallas_src>

<mosaic_0001>
module attributes {stable_mosaic.version = 11 : i64} {
  func.func @pool_project_kernel(%arg0: i32, %arg1: memref<16x256xbf16, #tpu.memory_space<vmem>>, %arg2: memref<256x50xbf16, #tpu.memory_space<vmem>>, %arg3: memref<4x32x8xf32, #tpu.memory_space<vmem>>, %arg4: memref<2x32x50xf32, #tpu.memory_space<vmem>>) attributes {dimension_semantics = [#tpu.dimension_semantics<parallel>], iteration_bounds = array<i64: 1>, scalar_prefetch = 0 : i64, scratch_operands = 0 : i64, tpu.core_type = #tpu.core_type<tc>, window_params = [{transform_indices = @transform_0, window_bounds = array<i64: 16, 256>}, {pipeline_mode = #tpu.pipeline_mode<synchronous>, transform_indices = @transform_1, window_bounds = array<i64: 256, 50>}, {pipeline_mode = #tpu.pipeline_mode<synchronous>, transform_indices = @transform_2, window_bounds = array<i64: 4, 32, 8>}, {transform_indices = @transform_3, window_bounds = array<i64: 2, 32, 50>}]} {
    %c0 = arith.constant 0 : index
    %c0_0 = arith.constant 0 : index
    %0 = vector.load %arg1[%c0, %c0_0] : memref<16x256xbf16, #tpu.memory_space<vmem>>, vector<16x256xbf16>
    %c0_1 = arith.constant 0 : index
    %c0_2 = arith.constant 0 : index
    %1 = vector.load %arg2[%c0_1, %c0_2] : memref<256x50xbf16, #tpu.memory_space<vmem>>, vector<256x50xbf16>
    %cst = arith.constant dense<0.000000e+00> : vector<16x50xf32>
    %2 = tpu.matmul %0, %1, %cst {dimension_numbers = #tpu.dot_dimension_numbers<[1], [0], [0], [1], [0, 0, 1, 1], [], []>} : vector<16x256xbf16>, vector<256x50xbf16>, vector<16x50xf32> -> vector<16x50xf32>
    %3 = tpu.iota {dimensions = array<i32: 1>} : vector<32x50xi32>
    %c0_i32 = arith.constant 0 : i32
    %4 = vector.broadcast %c0_i32 : i32 to vector<32x50xi32>
    %5 = arith.cmpi sge, %3, %4 : vector<32x50xi32>
    %c1_i32 = arith.constant 1 : i32
    %6 = vector.broadcast %c1_i32 : i32 to vector<32x50xi32>
    %7 = arith.cmpi slt, %3, %6 : vector<32x50xi32>
    %8 = arith.andi %5, %7 : vector<32x50xi1>
    %c1_i32_3 = arith.constant 1 : i32
    %9 = vector.broadcast %c1_i32_3 : i32 to vector<32x50xi32>
    %10 = arith.cmpi sge, %3, %9 : vector<32x50xi32>
    %c5_i32 = arith.constant 5 : i32
    %11 = vector.broadcast %c5_i32 : i32 to vector<32x50xi32>
    %12 = arith.cmpi slt, %3, %11 : vector<32x50xi32>
    %13 = arith.andi %10, %12 : vector<32x50xi1>
    %c5_i32_4 = arith.constant 5 : i32
    %14 = vector.broadcast %c5_i32_4 : i32 to vector<32x50xi32>
    %15 = arith.cmpi sge, %3, %14 : vector<32x50xi32>
    %c14_i32 = arith.constant 14 : i32
    %16 = vector.broadcast %c14_i32 : i32 to vector<32x50xi32>
    %17 = arith.cmpi slt, %3, %16 : vector<32x50xi32>
    %18 = arith.andi %15, %17 : vector<32x50xi1>
    %c14_i32_5 = arith.constant 14 : i32
    %19 = vector.broadcast %c14_i32_5 : i32 to vector<32x50xi32>
    %20 = arith.cmpi sge, %3, %19 : vector<32x50xi32>
    %c50_i32 = arith.constant 50 : i32
    %21 = vector.broadcast %c50_i32 : i32 to vector<32x50xi32>
    %22 = arith.cmpi slt, %3, %21 : vector<32x50xi32>
    %23 = arith.andi %20, %22 : vector<32x50xi1>
    %24 = vector.extract_strided_slice %2 {offsets = [0, 0], sizes = [8, 50], strides = [1, 1]} : vector<16x50xf32> to vector<8x50xf32>
    %cst_6 = arith.constant 0.000000e+00 : f32
    %25 = vector.broadcast %cst_6 : f32 to vector<32x50xf32>
    %c0_7 = arith.constant 0 : index
    %c0_8 = arith.constant 0 : index
    %c0_9 = arith.constant 0 : index
    %26 = vector.load %arg3[%c0_7, %c0_8, %c0_9] : memref<4x32x8xf32, #tpu.memory_space<vmem>>, vector<1x32x8xf32>
    %27 = vector.shape_cast %26 : vector<1x32x8xf32> to vector<32x8xf32>
    %cst_10 = arith.constant dense<0.000000e+00> : vector<32x50xf32>
    %28 = tpu.matmul %27, %24, %cst_10 {dimension_numbers = #tpu.dot_dimension_numbers<[1], [0], [0], [1], [0, 0, 1, 1], [], []>} : vector<32x8xf32>, vector<8x50xf32>, vector<32x50xf32> -> vector<32x50xf32>
    %29 = arith.select %8, %28, %25 : vector<32x50xi1>, vector<32x50xf32>
    %c1 = arith.constant 1 : index
    %c0_11 = arith.constant 0 : index
    %c0_12 = arith.constant 0 : index
    %30 = vector.load %arg3[%c1, %c0_11, %c0_12] : memref<4x32x8xf32, #tpu.memory_space<vmem>>, vector<1x32x8xf32>
    %31 = vector.shape_cast %30 : vector<1x32x8xf32> to vector<32x8xf32>
    %cst_13 = arith.constant dense<0.000000e+00> : vector<32x50xf32>
    %32 = tpu.matmul %31, %24, %cst_13 {dimension_numbers = #tpu.dot_dimension_numbers<[1], [0], [0], [1], [0, 0, 1, 1], [], []>} : vector<32x8xf32>, vector<8x50xf32>, vector<32x50xf32> -> vector<32x50xf32>
    %33 = arith.select %13, %32, %29 : vector<32x50xi1>, vector<32x50xf32>
    %c2 = arith.constant 2 : index
    %c0_14 = arith.constant 0 : index
    %c0_15 = arith.constant 0 : index
    %34 = vector.load %arg3[%c2, %c0_14, %c0_15] : memref<4x32x8xf32, #tpu.memory_space<vmem>>, vector<1x32x8xf32>
    %35 = vector.shape_cast %34 : vector<1x32x8xf32> to vector<32x8xf32>
    %cst_16 = arith.constant dense<0.000000e+00> : vector<32x50xf32>
    %36 = tpu.matmul %35, %24, %cst_16 {dimension_numbers = #tpu.dot_dimension_numbers<[1], [0], [0], [1], [0, 0, 1, 1], [], []>} : vector<32x8xf32>, vector<8x50xf32>, vector<32x50xf32> -> vector<32x50xf32>
    %37 = arith.select %18, %36, %33 : vector<32x50xi1>, vector<32x50xf32>
    %c3 = arith.constant 3 : index
    %c0_17 = arith.constant 0 : index
    %c0_18 = arith.constant 0 : index
    %38 = vector.load %arg3[%c3, %c0_17, %c0_18] : memref<4x32x8xf32, #tpu.memory_space<vmem>>, vector<1x32x8xf32>
    %39 = vector.shape_cast %38 : vector<1x32x8xf32> to vector<32x8xf32>
    %cst_19 = arith.constant dense<0.000000e+00> : vector<32x50xf32>
    %40 = tpu.matmul %39, %24, %cst_19 {dimension_numbers = #tpu.dot_dimension_numbers<[1], [0], [0], [1], [0, 0, 1, 1], [], []>} : vector<32x8xf32>, vector<8x50xf32>, vector<32x50xf32> -> vector<32x50xf32>
    %41 = arith.select %23, %40, %37 : vector<32x50xi1>, vector<32x50xf32>
    %c0_20 = arith.constant 0 : index
    %c0_21 = arith.constant 0 : index
    %c0_22 = arith.constant 0 : index
    %42 = vector.load %arg4[%c0_20, %c0_21, %c0_22] : memref<2x32x50xf32, #tpu.memory_space<vmem>>, vector<1x32x50xf32>
    %43 = vector.shape_cast %42 : vector<1x32x50xf32> to vector<32x50xf32>
    %44 = vector.shape_cast %41 : vector<32x50xf32> to vector<1x32x50xf32>
    tpu.vector_store %arg4[%c0_20, %c0_21, %c0_22], %44 {strides = array<i32>} : memref<2x32x50xf32, #tpu.memory_space<vmem>>, vector<1x32x50xf32>,
    %45 = vector.extract_strided_slice %2 {offsets = [8, 0], sizes = [8, 50], strides = [1, 1]} : vector<16x50xf32> to vector<8x50xf32>
    %cst_23 = arith.constant 0.000000e+00 : f32
    %46 = vector.broadcast %cst_23 : f32 to vector<32x50xf32>
    %c0_24 = arith.constant 0 : index
    %c0_25 = arith.constant 0 : index
    %c0_26 = arith.constant 0 : index
    %47 = vector.load %arg3[%c0_24, %c0_25, %c0_26] : memref<4x32x8xf32, #tpu.memory_space<vmem>>, vector<1x32x8xf32>
    %48 = vector.shape_cast %47 : vector<1x32x8xf32> to vector<32x8xf32>
    %cst_27 = arith.constant dense<0.000000e+00> : vector<32x50xf32>
    %49 = tpu.matmul %48, %45, %cst_27 {dimension_numbers = #tpu.dot_dimension_numbers<[1], [0], [0], [1], [0, 0, 1, 1], [], []>} : vector<32x8xf32>, vector<8x50xf32>, vector<32x50xf32> -> vector<32x50xf32>
    %50 = arith.select %8, %49, %46 : vector<32x50xi1>, vector<32x50xf32>
    %c1_28 = arith.constant 1 : index
    %c0_29 = arith.constant 0 : index
    %c0_30 = arith.constant 0 : index
    %51 = vector.load %arg3[%c1_28, %c0_29, %c0_30] : memref<4x32x8xf32, #tpu.memory_space<vmem>>, vector<1x32x8xf32>
    %52 = vector.shape_cast %51 : vector<1x32x8xf32> to vector<32x8xf32>
    %cst_31 = arith.constant dense<0.000000e+00> : vector<32x50xf32>
    %53 = tpu.matmul %52, %45, %cst_31 {dimension_numbers = #tpu.dot_dimension_numbers<[1], [0], [0], [1], [0, 0, 1, 1], [], []>} : vector<32x8xf32>, vector<8x50xf32>, vector<32x50xf32> -> vector<32x50xf32>
    %54 = arith.select %13, %53, %50 : vector<32x50xi1>, vector<32x50xf32>
    %c2_32 = arith.constant 2 : index
    %c0_33 = arith.constant 0 : index
    %c0_34 = arith.constant 0 : index
    %55 = vector.load %arg3[%c2_32, %c0_33, %c0_34] : memref<4x32x8xf32, #tpu.memory_space<vmem>>, vector<1x32x8xf32>
    %56 = vector.shape_cast %55 : vector<1x32x8xf32> to vector<32x8xf32>
    %cst_35 = arith.constant dense<0.000000e+00> : vector<32x50xf32>
    %57 = tpu.matmul %56, %45, %cst_35 {dimension_numbers = #tpu.dot_dimension_numbers<[1], [0], [0], [1], [0, 0, 1, 1], [], []>} : vector<32x8xf32>, vector<8x50xf32>, vector<32x50xf32> -> vector<32x50xf32>
    %58 = arith.select %18, %57, %54 : vector<32x50xi1>, vector<32x50xf32>
    %c3_36 = arith.constant 3 : index
    %c0_37 = arith.constant 0 : index
    %c0_38 = arith.constant 0 : index
    %59 = vector.load %arg3[%c3_36, %c0_37, %c0_38] : memref<4x32x8xf32, #tpu.memory_space<vmem>>, vector<1x32x8xf32>
    %60 = vector.shape_cast %59 : vector<1x32x8xf32> to vector<32x8xf32>
    %cst_39 = arith.constant dense<0.000000e+00> : vector<32x50xf32>
    %61 = tpu.matmul %60, %45, %cst_39 {dimension_numbers = #tpu.dot_dimension_numbers<[1], [0], [0], [1], [0, 0, 1, 1], [], []>} : vector<32x8xf32>, vector<8x50xf32>, vector<32x50xf32> -> vector<32x50xf32>
    %62 = arith.select %23, %61, %58 : vector<32x50xi1>, vector<32x50xf32>
    %c1_40 = arith.constant 1 : index
    %c0_41 = arith.constant 0 : index
    %c0_42 = arith.constant 0 : index
    %63 = vector.load %arg4[%c1_40, %c0_41, %c0_42] : memref<2x32x50xf32, #tpu.memory_space<vmem>>, vector<1x32x50xf32>
    %64 = vector.shape_cast %63 : vector<1x32x50xf32> to vector<32x50xf32>
    %65 = vector.shape_cast %62 : vector<32x50xf32> to vector<1x32x50xf32>
    tpu.vector_store %arg4[%c1_40, %c0_41, %c0_42], %65 {strides = array<i32>} : memref<2x32x50xf32, #tpu.memory_space<vmem>>, vector<1x32x50xf32>,
    return
  }
  func.func @transform_0(%arg0: i32) -> (i32, i32) {
    %c0_i32 = arith.constant 0 : i32
    %c0_i32_0 = arith.constant 0 : i32
    return %arg0, %c0_i32 : i32, i32
  }
  func.func @transform_1(%arg0: i32) -> (i32, i32) {
    %c0_i32 = arith.constant 0 : i32
    %c0_i32_0 = arith.constant 0 : i32
    %c0_i32_1 = arith.constant 0 : i32
    return %c0_i32, %c0_i32_0 : i32, i32
  }
  func.func @transform_2(%arg0: i32) -> (i32, i32, i32) {
    %c0_i32 = arith.constant 0 : i32
    %c0_i32_0 = arith.constant 0 : i32
    %c0_i32_1 = arith.constant 0 : i32
    %c0_i32_2 = arith.constant 0 : i32
    return %c0_i32, %c0_i32_0, %c0_i32_1 : i32, i32, i32
  }
  func.func @transform_3(%arg0: i32) -> (i32, i32, i32) {
    %c0_i32 = arith.constant 0 : i32
    %c0_i32_0 = arith.constant 0 : i32
    %c0_i32_1 = arith.constant 0 : i32
    return %arg0, %c0_i32, %c0_i32_0 : i32, i32, i32
  }
}

</mosaic_0001>

<bundles_post_ra>
// kernel: tpu_custom_call.1
= control target key start
LH: loop header
LB: loop body
LE: loop exit
PB: predicated region body
PF: predicated region fallthrough
CT: control target
= control target key end

     0   :  { %s1580_s0 = inlined_call_operand.vmem [shape: bf16[16,256], index: 0, kind: input, shape index: {}]   ;;  %s1581_s1 = inlined_call_operand.vmem [shape: bf16[256,50], index: 1, kind: input, shape index: {}]   ;;  %s1582_s2 = inlined_call_operand.vmem [shape: f32[4,32,8], index: 2, kind: input, shape index: {}]   ;;  %s1583_s3 = inlined_call_operand.hbm [shape: f32[2,32,50], index: 3, kind: output, shape index: {}]  }
   0x1   :  { %v1286_v0 = vld [vmem:[%s1581_s1 + $0x78] sm:$0xff]   ;;  %v1288_v2 = vld [vmem:[%s1581_s1 + $0x70] sm:$0xff]   ;;  %v1290_v4 = vld [vmem:[%s1581_s1 + $0x68] sm:$0xff]  }
   0x2   :  { %v1287_v1 = vld [vmem:[%s1581_s1 + $0x38] sm:$0xff]   ;;  %1155 = vmatprep.subr.bf16.mxu0 %v1286_v0  ;;  %v1289_v3 = vld [vmem:[%s1581_s1 + $0x30] sm:$0xff]   ;;  %v1291_v5 = vld [vmem:[%s1581_s1 + $0x28] sm:$0xff]  }
   0x3   :  { %1156 = vmatpush3.bf16.msra.mxu0 %v1287_v1  ;;  %v1292_v6 = vld [vmem:[%s1581_s1 + $0x60] sm:$0xff]   ;;  %v1294_v8 = vld [vmem:[%s1581_s1 + $0x58] sm:$0xff]   ;;  %v1296_v10 = vld [vmem:[%s1581_s1 + $0x50] sm:$0xff]  }
   0x4   :  { %1157 = vmatprep.subr.bf16.mxu0 %v1288_v2  ;;  %v1293_v7 = vld [vmem:[%s1581_s1 + $0x20] sm:$0xff]   ;;  %v1295_v9 = vld [vmem:[%s1581_s1 + $0x18] sm:$0xff]  }
   0x5   :  { %v1304_v11 = vld [vmem:[%s1580_s0 + $0x4] ss:$8 sps:$4 sm:$0xff]  }
   0x7   :  { %1158 = vmatpush3.bf16.msra.mxu0 %v1289_v3 }
   0x8   :  { %1159 = vmatprep.subr.bf16.mxu0 %v1290_v4 }
   0xb   :  { %1160 = vmatpush3.bf16.msra.mxu0 %v1291_v5 }
   0xc   :  { %1161 = vmatprep.subr.bf16.mxu0 %v1292_v6 }
   0xf   :  { %1162 = vmatpush3.bf16.msra.mxu0 %v1293_v7 }
  0x10   :  { %1163 = vmatprep.subr.bf16.mxu0 %v1294_v8 }
  0x11   :  { %8 = vsyncpa [#allocation3], 0  ;;  %v1297_v12 = vld [vmem:[%s1581_s1 + $0x10] sm:$0xff]   ;;  %188 = vmatprep.mubr.bf16.mxu0 %v1304_v11  ;;  %v1298_v13 = vld [vmem:[%s1581_s1 + $0x48] sm:$0xff]   ;;  %vm215_vm0 = vcmask 64512   ;;  %v197_v46 = vlaneseq  ;;  %vm635_vm11 = vcmask 408576  }
  0x12   :  { %v1299_v14 = vld [vmem:[%s1581_s1 + $0x8] sm:$0xff]   ;;  %v1300_v15 = vld [vmem:[%s1581_s1 + $0x40] sm:$0xff]   ;;  %v213_v25 = vld [vmem:[%s1582_s2 + $0x10] sm:$0xff] }
  0x13   :  { %1164 = vmatpush3.bf16.msra.mxu0 %v1295_v9  ;;  %v1301_v16 = vld [vmem:[%s1581_s1] sm:$0xff]   ;;  %v212_v24 = vld [vmem:[%s1582_s2 + $0x8] sm:$0xff]  ;;  %v214_v28 = vld [vmem:[%s1582_s2 + $0x18] sm:$0xff]  ;;  %v1484_v49 = vand.u32 127, %v197_v46 }
  0x14   :  { %1165 = vmatprep.subr.bf16.mxu0 %v1296_v10  ;;  %v1302_v17 = vld [vmem:[%s1580_s0] ss:$8 sps:$4 sm:$0xff]   ;;  %v1105_v31 = vld [vmem:[%s1582_s2 + $0x30] sm:$0xff]  ;;  %v1106_v32 = vld [vmem:[%s1582_s2 + $0x38] sm:$0xff] }
  0x15   :  { %v211_v18 = vld [vmem:[%s1582_s2] sm:$0xff]  ;;  %v1132_v29 = vld [vmem:[%s1582_s2 + $0x28] sm:$0xff]  ;;  %v1121_v35 = vld [vmem:[%s1582_s2 + $0x70] sm:$0xff]  ;;  %vm202_vm1 = vcmp.ge.s32.totalorder %v1484_v49, 1  ;;  %vm203_vm2 = vcmp.lt.s32.totalorder %v1484_v49, 5  ;;  %vm205_vm3 = vcmp.ge.s32.totalorder %v1484_v49, 5 }
  0x16   :  { %1219 = vmatprep.mubr.msk.f32.mxu1 %vm215_vm0, %v211_v18  ;;  %v1131_v19 = vld [vmem:[%s1582_s2 + $0x20] sm:$0xff]  ;;  %v1120_v33 = vld [vmem:[%s1582_s2 + $0x68] sm:$0xff]  ;;  %v1122_v37 = vld [vmem:[%s1582_s2 + $0x78] sm:$0xff]  ;;  %vm206_vm4 = vcmp.lt.s32.totalorder %v1484_v49, 14  ;;  %vm200_vm5 = vcmp.lt.s32.totalorder %v1484_v49, 1  ;;  %vm208_vm6 = vcmp.ge.s32.totalorder %v1484_v49, 14 }
  0x17   :  { %1166 = vmatpush3.bf16.msra.mxu0 %v1297_v12  ;;  %v1119_v30 = vld [vmem:[%s1582_s2 + $0x60] sm:$0xff]  ;;  %v1112_v36 = vld [vmem:[%s1582_s2 + $0x48] sm:$0xff]  ;;  %v1113_v38 = vld [vmem:[%s1582_s2 + $0x50] sm:$0xff]  ;;  %vm209_vm7 = vcmp.lt.s32.totalorder %v1484_v49, 50 }
  0x18   :  { %1167 = vmatprep.subr.bf16.mxu0 %v1298_v13  ;;  %v1111_v34 = vld [vmem:[%s1582_s2 + $0x40] sm:$0xff]  ;;  %v1114_v39 = vld [vmem:[%s1582_s2 + $0x58] sm:$0xff]  ;;  %vm1493_vm8 = vmand %vm202_vm1, %vm203_vm2  ;;  %s1327_s2 = smov [#allocation2]  }
  0x19   :  { %vm1497_vm9 = vmand %vm205_vm3, %vm206_vm4  ;;  %s1070_s24 = sshll.u32 %s1327_s2, 4  ;;  %s1071_s24 = int_to_ptr.vmem [resolvable:$true] %s1070_s24 }
  0x1a   :  { %vm1503_vm10 = vmand %vm208_vm6, %vm209_vm7  ;;  %s1305_s0 = scalar_lea.vmem %s1071_s24, 1024  ;;  %p1310_p1 = scmp.lt.s32.totalorder %s1071_s24, %s1071_s24 }
  0x1b   :  { %1168 = vmatpush3.bf16.msra.mxu0 %v1299_v14  ;;  %p1306_p0 = scmp.ne.s32.totalorder %s1071_s24, %s1305_s0  ;;  %p1311_p2 = scmp.lt.s32.totalorder %s1305_s0, %s1305_s0 }
  0x1c   :  { %1169 = vmatprep.subr.bf16.mxu0 %v1300_v15 }
  0x1d   :  { %p1312_p3 = por %p1311_p2, %p1310_p1 }
  0x1f   :  { %1170 = vmatpush3.bf16.msra.mxu0 %v1301_v16  ;;  %p1313_p4 = pnand %p1312_p3, %p1306_p0 }
  0x22   :  { %189 = vmatmul.mubr.bf16.vlgmr.msra.gmra.mxu0 %v1302_v17 }
  0x23   :  { %1259 = vmatprep.mubr.msk.f32.mxu0 %vm215_vm0, %v1131_v19 }
  0xe2   :  { %v1171_v20 = vpop.f32.mrf.mxu0 }
  0xe4   :  { %v1172_v21 = vpop.f32.mrf.mxu0 }
  0xe5   :  { %v1173_v22 = vadd.f32 %v1172_v21, %v1171_v20 }
  0xe6   :  { %v1174_v23 = vpop.f32.mrf.mxu0 }
  0xe7   :  { %1217 = vmatprep.subr.mxu1 %v1173_v22 }
  0xe8   :  { %v1175_v26 = vpop.f32.mrf.mxu0  ;;  %1218 = vmatpush3.msra.mxu1 %v1173_v22 }
  0xe9   :  { %v1176_v27 = vadd.f32 %v1175_v26, %v1174_v23  ;;  %1220 = vmatmul.mubr.msk.f32.vlgmr.msra.gmra.mxu1 %vm215_vm0, %v212_v24  ;;  %1225 = vmatprep.subr.mxu1 %v1173_v22 }
  0xea   :  { %1226 = vmatpush3.msra.mxu1 %v1173_v22  ;;  %1222 = vmatprep.mubr.msk.f32.mxu1 %vm215_vm0, %v213_v25 }
  0xeb   :  { %1233 = vmatprep.subr.mxu1 %v1173_v22  ;;  %1257 = vmatprep.subr.mxu0 %v1176_v27 }
  0xec   :  { %1258 = vmatpush3.msra.mxu0 %v1176_v27 }
  0xed   :  { %1223 = vmatmul.mubr.msk.f32.gmra.mxu1 %vm215_vm0, %v214_v28  ;;  %1273 = vmatprep.subr.mxu0 %v1176_v27 }
  0xee   :  { %1260 = vmatmul.mubr.msk.f32.vlgmr.msra.gmra.mxu0 %vm215_vm0, %v1132_v29  ;;  %1227 = vmatprep.mubr.msk.f32.mxu1 %vm215_vm0, %v1131_v19 }
  0xef   :  { %1274 = vmatpush3.msra.mxu0 %v1176_v27  ;;  %1275 = vmatprep.mubr.msk.f32.mxu0 %vm215_vm0, %v1119_v30 }
  0xf1   :  { %1228 = vmatmul.mubr.msk.f32.vlgmr.msra.gmra.mxu1 %vm215_vm0, %v1132_v29 }
  0xf2   :  { %1234 = vmatpush3.msra.mxu1 %v1173_v22  ;;  %1230 = vmatprep.mubr.msk.f32.mxu1 %vm215_vm0, %v1105_v31 }
  0xf3   :  { %1241 = vmatprep.subr.mxu1 %v1173_v22  ;;  %1276 = vmatmul.mubr.msk.f32.vlgmr.msra.gmra.mxu0 %vm215_vm0, %v1120_v33 }
  0xf4   :  { %1278 = vmatprep.mubr.msk.f32.mxu0 %vm215_vm0, %v1121_v35 }
  0xf5   :  { %1231 = vmatmul.mubr.msk.f32.gmra.mxu1 %vm215_vm0, %v1106_v32 }
  0xf6   :  { %1235 = vmatprep.mubr.msk.f32.mxu1 %vm215_vm0, %v1111_v34 }
  0xf7   :  { %1279 = vmatmul.mubr.msk.f32.gmra.mxu0 %vm215_vm0, %v1122_v37 }
  0xf9   :  { %1236 = vmatmul.mubr.msk.f32.vlgmr.msra.gmra.mxu1 %vm215_vm0, %v1112_v36 }
  0xfa   :  { %1242 = vmatpush3.msra.mxu1 %v1173_v22  ;;  %1238 = vmatprep.mubr.msk.f32.mxu1 %vm215_vm0, %v1113_v38 }
  0xfb   :  { %1249 = vmatprep.subr.mxu1 %v1176_v27 }
  0xfd   :  { %1239 = vmatmul.mubr.msk.f32.gmra.mxu1 %vm215_vm0, %v1114_v39 }
  0xfe   :  { %1243 = vmatprep.mubr.msk.f32.mxu1 %vm215_vm0, %v1119_v30 }
 0x101   :  { %1244 = vmatmul.mubr.msk.f32.vlgmr.msra.gmra.mxu1 %vm215_vm0, %v1120_v33 }
 0x102   :  { %1250 = vmatpush3.msra.mxu1 %v1176_v27  ;;  %1246 = vmatprep.mubr.msk.f32.mxu1 %vm215_vm0, %v1121_v35 }
 0x103   :  { %1281 = vmatprep.subr.mxu1 %v1176_v27 }
 0x105   :  { %1247 = vmatmul.mubr.msk.f32.gmra.mxu1 %vm215_vm0, %v1122_v37 }
 0x106   :  { %1251 = vmatprep.mubr.msk.f32.mxu1 %vm215_vm0, %v211_v18 }
 0x109   :  { %1252 = vmatmul.mubr.msk.f32.vlgmr.msra.gmra.mxu1 %vm215_vm0, %v212_v24 }
 0x10a   :  { %1282 = vmatpush3.msra.mxu1 %v1176_v27  ;;  %1254 = vmatprep.mubr.msk.f32.mxu1 %vm215_vm0, %v213_v25 }
 0x10b   :  { %1265 = vmatprep.subr.mxu1 %v1176_v27 }
 0x10d   :  { %1255 = vmatmul.mubr.msk.f32.gmra.mxu1 %vm215_vm0, %v214_v28 }
 0x10e   :  { %1262 = vmatprep.mubr.msk.f32.mxu1 %vm215_vm0, %v1105_v31 }
 0x111   :  { %1263 = vmatmul.mubr.msk.f32.vlgmr.msra.gmra.mxu1 %vm215_vm0, %v1106_v32 }
 0x112   :  { %1266 = vmatpush3.msra.mxu1 %v1176_v27  ;;  %1267 = vmatprep.mubr.msk.f32.mxu1 %vm215_vm0, %v1111_v34 }
 0x115   :  { %1268 = vmatmul.mubr.msk.f32.vlgmr.msra.gmra.mxu1 %vm215_vm0, %v1112_v36 }
 0x116   :  { %1270 = vmatprep.mubr.msk.f32.mxu1 %vm215_vm0, %v1113_v38 }
 0x119   :  { %1271 = vmatmul.mubr.msk.f32.gmra.mxu1 %vm215_vm0, %v1114_v39 }
 0x1a9   :  { %v1221_v40 = vpop.f32.mrf.mxu1 }
 0x1aa   :  { %v314_v55 = vsel %vm200_vm5, %v1221_v40, 0.0 }
 0x1ab   :  { %v294_v41 = vpop.f32.mrf.mxu1 }
 0x1ac   :  { %v313_v59 = vsel %vm200_vm5, %v294_v41, 0.0 }
 0x1ad   :  { %v1224_v42 = vpop.f32.mrf.mxu1 }
 0x1ae   :  { %v316_v0 = vsel %vm200_vm5, %v1224_v42, 0.0  ;;  %v1261_v14 = vpop.f32.mrf.mxu0 }
 0x1af   :  { %v304_v43 = vpop.f32.mrf.mxu1 }
 0x1b0   :  { %v315_v5 = vsel %vm200_vm5, %v304_v43, 0.0  ;;  %v827_v17 = vpop.f32.mrf.mxu0 }
 0x1b1   :  { %v1229_v44 = vpop.f32.mrf.mxu1 }
 0x1b2   :  { %v420_v58 = vsel %vm1493_vm8, %v1229_v44, %v314_v55 }
 0x1b3   :  { %v400_v45 = vpop.f32.mrf.mxu1  ;;  %v1277_v19 = vpop.f32.mrf.mxu0 }
 0x1b4   :  { %v419_v62 = vsel %vm1493_vm8, %v400_v45, %v313_v59 }
 0x1b5   :  { %v1232_v47 = vpop.f32.mrf.mxu1  ;;  %v1037_v24 = vpop.f32.mrf.mxu0 }
 0x1b6   :  { %v422_v3 = vsel %vm1493_vm8, %v1232_v47, %v316_v0 }
 0x1b7   :  { %v410_v48 = vpop.f32.mrf.mxu1  ;;  %v1280_v33 = vpop.f32.mrf.mxu0 }
 0x1b8   :  { %v421_v8 = vsel %vm1493_vm8, %v410_v48, %v315_v5 }
 0x1b9   :  { %v1237_v50 = vpop.f32.mrf.mxu1  ;;  %v1047_v43 = vpop.f32.mrf.mxu0 }
 0x1ba   :  { %v526_v60 = vsel %vm1497_vm9, %v1237_v50, %v420_v58 }
 0x1bb   :  { %v506_v51 = vpop.f32.mrf.mxu1 }
 0x1bc   :  { %v525_v1 = vsel %vm1497_vm9, %v506_v51, %v419_v62 }
 0x1bd   :  { %v1240_v53 = vpop.f32.mrf.mxu1 }
 0x1be   :  { %v528_v6 = vsel %vm1497_vm9, %v1240_v53, %v422_v3 }
 0x1bf   :  { %v516_v56 = vpop.f32.mrf.mxu1 }
 0x1c0   :  { %v527_v10 = vsel %vm1497_vm9, %v516_v56, %v421_v8 }
 0x1c1   :  { %v1245_v61 = vpop.f32.mrf.mxu1 }
 0x1c2   :  { %v632_v63 = vsel %vm1503_vm10, %v1245_v61, %v526_v60 }
 0x1c3   :  { %637 = vst.msk [vmem:[#allocation2 + $0x8] sm:$0xff] %vm635_vm11, %v632_v63  ;;  %v612_v2 = vpop.f32.mrf.mxu1 }
 0x1c4   :  { %v631_v4 = vsel %vm1503_vm10, %v612_v2, %v525_v1 }
 0x1c5   :  { %636 = vst.msk [vmem:[#allocation2] sm:$0xff] %vm635_vm11, %v631_v4  ;;  %v1248_v7 = vpop.f32.mrf.mxu1 }
 0x1c6   :  { %v634_v9 = vsel %vm1503_vm10, %v1248_v7, %v528_v6 }
 0x1c7   :  { %639 = vst.msk [vmem:[#allocation2 + $0x18] sm:$0xff] %vm635_vm11, %v634_v9  ;;  %v622_v11 = vpop.f32.mrf.mxu1 }
 0x1c8   :  { %v633_v12 = vsel %vm1503_vm10, %v622_v11, %v527_v10 }
 0x1c9   :  { %638 = vst.msk [vmem:[#allocation2 + $0x10] sm:$0xff] %vm635_vm11, %v633_v12  ;;  %v1253_v13 = vpop.f32.mrf.mxu1 }
 0x1ca   :  { %v742_v21 = vsel %vm200_vm5, %v1253_v13, 0.0 }
 0x1cb   :  { %v722_v15 = vpop.f32.mrf.mxu1  ;;  %v847_v25 = vsel %vm1493_vm8, %v1261_v14, %v742_v21 }
 0x1cc   :  { %v741_v23 = vsel %vm200_vm5, %v722_v15, 0.0 }
 0x1cd   :  { %v1256_v16 = vpop.f32.mrf.mxu1  ;;  %v846_v28 = vsel %vm1493_vm8, %v827_v17, %v741_v23 }
 0x1ce   :  { %v744_v31 = vsel %vm200_vm5, %v1256_v16, 0.0 }
 0x1cf   :  { %v732_v18 = vpop.f32.mrf.mxu1 }
 0x1d0   :  { %v743_v37 = vsel %vm200_vm5, %v732_v18, 0.0 }
 0x1d1   :  { %v1264_v20 = vpop.f32.mrf.mxu1 }
 0x1d2   :  { %v849_v34 = vsel %vm1493_vm8, %v1264_v20, %v744_v31 }
 0x1d3   :  { %v837_v22 = vpop.f32.mrf.mxu1 }
 0x1d4   :  { %v848_v39 = vsel %vm1493_vm8, %v837_v22, %v743_v37 }
 0x1d5   :  { %v1269_v26 = vpop.f32.mrf.mxu1 }
 0x1d6   :  { %v952_v27 = vsel %vm1497_vm9, %v1269_v26, %v847_v25 }
 0x1d7   :  { %v1057_v29 = vsel %vm1503_vm10, %v1277_v19, %v952_v27  ;;  %v932_v30 = vpop.f32.mrf.mxu1 }
 0x1d8   :  { %1062 = vst.msk [vmem:[#allocation2 + $0x28] sm:$0xff] %vm635_vm11, %v1057_v29  ;;  %v951_v32 = vsel %vm1497_vm9, %v932_v30, %v846_v28 }
 0x1d9   :  { %v1056_v35 = vsel %vm1503_vm10, %v1037_v24, %v951_v32  ;;  %v1272_v36 = vpop.f32.mrf.mxu1 }
 0x1da   :  { %1061 = vst.msk [vmem:[#allocation2 + $0x20] sm:$0xff] %vm635_vm11, %v1056_v35  ;;  %v954_v38 = vsel %vm1497_vm9, %v1272_v36, %v849_v34 }
 0x1db   :  { %v1059_v40 = vsel %vm1503_vm10, %v1280_v33, %v954_v38  ;;  %v942_v41 = vpop.f32.mrf.mxu1 }
 0x1dc   :  { %1064 = vst.msk [vmem:[#allocation2 + $0x38] sm:$0xff] %vm635_vm11, %v1059_v40  ;;  %v953_v42 = vsel %vm1497_vm9, %v942_v41, %v848_v39 }
 0x1dd   :  { %v1058_v44 = vsel %vm1503_vm10, %v1047_v43, %v953_v42 }
 0x1de   :  { %1063 = vst.msk [vmem:[#allocation2 + $0x30] sm:$0xff] %vm635_vm11, %v1058_v44 }
 0x1df   :  { %1316 = shalt.err (!%p1313_p4)
}
 0x1e0   :  { %s1328_s1 = smov 128   ;;  %s1329_s25 = smov 8  }
 0x1e1   :  { %1076 = dma.vmem_to_hbm [thread:$0]  %s1071_s24, 1024, %s1583_s3, [#allocation3], %s1328_s1, %s1328_s1, %s1329_s25  }
 0x1e2   :  { %1325 = dma.done.wait [#allocation3], 1024  }
 0x1e3   :  { %1326 = vsyncadd [#allocation3], 4294966272 }
 0x1e4   :  { %1080 = vsyncpa [#allocation3], 1 }

</bundles_post_ra>
